<compile_context>
chip_gen: v7x
topology: tpu7x:2x2x1
jax: 0.10.0
libtpu: 0.0.40
codegen_flags: <defaults>
</compile_context>

<pallas_src>
import functools

import jax
import jax.numpy as jnp
from jax.experimental import pallas as pl
from jax.experimental.pallas import tpu as pltpu

_LANE = 128
_SUBLANE = 8


def _round_up(x, m):
    return ((x + m - 1) // m) * m


def _critic_kernel(s_ref, a_ref, w1s_ref, w1a_ref, b1_ref, w2_ref, b2_ref,
                   w3_ref, b3_ref, w4_ref, b4_ref, o_ref):
    wdt = w2_ref.dtype  # MXU operand dtype (bf16 by default, or f32)

    # layer1c1: one logical (tb, d_s+d_a) x (d_s+d_a, Hp) matmul written as two
    # adjacent dots (state half + action half) accumulated in f32, ReLU in f32.
    # TODO(synk): pack state/action into one (tb, d_in) VMEM scratch to collapse
    # this into a single K=d_in MXU pass (saves one MXU push/drain per step).
    h = (jnp.dot(s_ref[...].astype(wdt), w1s_ref[...],
                 preferred_element_type=jnp.float32)
         + jnp.dot(a_ref[...].astype(wdt), w1a_ref[...],
                   preferred_element_type=jnp.float32)
         + b1_ref[...])
    h = jnp.maximum(h, 0.0)

    # layer2c1 + ReLU
    h = jnp.dot(h.astype(wdt), w2_ref[...],
                preferred_element_type=jnp.float32) + b2_ref[...]
    h = jnp.maximum(h, 0.0)

    # layer3c1 + ReLU
    h = jnp.dot(h.astype(wdt), w3_ref[...],
                preferred_element_type=jnp.float32) + b3_ref[...]
    h = jnp.maximum(h, 0.0)

    # outputc1: (H,1) projection as VPU multiply + XLU lane reduce, then a cheap
    # (tb,1)->(1,tb) XLU relayout so the store / HBM writeback is lane-dense.
    q_col = jnp.sum(h * w4_ref[...], axis=-1, keepdims=True)   # (tb, 1) f32
    q_row = jnp.transpose(q_col) + b4_ref[...]                  # (1, tb) f32
    o_ref[...] = q_row.astype(o_ref.dtype)


def _pick_batch_tile(B, in_row_bytes, Hp, weight_bytes, block_b):
    """VMEM-budget-derived batch tile (trace-time, generation-aware)."""
    try:
        vmem_cap = int(getattr(pltpu.get_tpu_info(), "vmem_capacity_bytes",
                               128 * 1024 * 1024))
    except Exception:
        vmem_cap = 64 * 1024 * 1024  # conservative fallback
    small_vmem = vmem_cap <= (96 * 1024 * 1024)   # v7x-like: 64 MiB / TC, 2 TCs
    budget = int(vmem_cap * 0.87)                 # leave headroom for internals

    # Per-row VMEM: double-buffered state/action tiles, double-buffered lane-dense
    # f32 output row, ~4 live (tb, Hp) f32 intermediates inside the body.
    per_row = 2 * in_row_bytes + 2 * 4 + 4 * Hp * 4
    avail = budget - weight_bytes - (4 * 1024 * 1024)  # Mosaic internal scratch margin
    cap = 2048 if small_vmem else 4096

    tb = min(cap, max(_SUBLANE, avail // max(per_row, 1)))
    if block_b is not None:
        tb = min(tb, block_b)
    if small_vmem and B >= 2 * _SUBLANE:
        tb = min(tb, -(-B // 2))   # keep >=2 grid steps so both TCs get work
    tb = min(tb, B)
    tb = _round_up(max(tb, _SUBLANE), _SUBLANE)
    return tb, budget


@functools.partial(jax.jit, static_argnames=("block_b",))
def critic_q1_forward(state, action, packed, *, block_b=None):
    """Pallas forward of CriticQ1.

    state: (B, num_inputs), action: (B, num_actions), packed: dict from pack_params().
    """
    # Accept f32 or bf16 inputs directly (no wrapper-side cast round trip);
    # anything else is promoted to f32.
    if state.dtype not in (jnp.float32, jnp.bfloat16):
        state = state.astype(jnp.float32)
    if action.dtype not in (jnp.float32, jnp.bfloat16):
        action = action.astype(jnp.float32)

    B, d_s = state.shape
    _, d_a = action.shape
    Hp = packed["w2"].shape[1]
    wdt = packed["w2"].dtype
    itemw = jnp.dtype(wdt).itemsize

    # VMEM-resident weight footprint (sublane-padded for the (1,Hp)/(1,1) rows).
    d_s8, d_a8 = _round_up(d_s, _SUBLANE), _round_up(d_a, _SUBLANE)
    weight_bytes = ((d_s8 + d_a8) * Hp + 2 * Hp * Hp) * itemw \
                   + 4 * _SUBLANE * Hp * 4 + _SUBLANE * _LANE * 4

    in_row_bytes = d_s * state.dtype.itemsize + d_a * action.dtype.itemsize
    tb, vmem_limit = _pick_batch_tile(B, in_row_bytes, Hp, weight_bytes, block_b)

    Bp = _round_up(B, tb)
    if Bp != B:  # ragged tail: zero-pad, slice back after the kernel
        state = jnp.pad(state, ((0, Bp - B), (0, 0)))
        action = jnp.pad(action, ((0, Bp - B), (0, 0)))
    num_tiles = Bp // tb

    # Weights/biases: whole-array, VMEM-resident, single-buffered (constant across grid).
    vmem_full = pl.BlockSpec(memory_space=pltpu.MemorySpace.VMEM)

    flops = 2 * Bp * ((d_s + d_a) * Hp + 2 * Hp * Hp + Hp)
    bytes_accessed = int(weight_bytes + Bp * in_row_bytes + Bp * 4)

    out = pl.pallas_call(
        _critic_kernel,
        out_shape=jax.ShapeDtypeStruct((num_tiles, tb), jnp.float32),
        grid_spec=pltpu.PrefetchScalarGridSpec(
            num_scalar_prefetch=0,
            grid=(num_tiles,),
            in_specs=[
                pl.BlockSpec((tb, d_s), lambda i: (i, 0)),   # state tile
                pl.BlockSpec((tb, d_a), lambda i: (i, 0)),   # action tile
                vmem_full, vmem_full, vmem_full,             # w1s, w1a, b1
                vmem_full, vmem_full,                        # w2, b2
                vmem_full, vmem_full,                        # w3, b3
                vmem_full, vmem_full,                        # w4_row, b4
            ],
            # Lane-dense output: one full (1, tb) row per grid step.
            out_specs=pl.BlockSpec((1, tb), lambda i: (i, 0)),
        ),
        compiler_params=pltpu.CompilerParams(
            dimension_semantics=("parallel",),
            vmem_limit_bytes=int(vmem_limit)),
        cost_estimate=pl.CostEstimate(flops=int(flops), transcendentals=0,
                                      bytes_accessed=bytes_accessed),
    )(state, action,
      packed["w1s"], packed["w1a"], packed["b1"],
      packed["w2"], packed["b2"],
      packed["w3"], packed["b3"],
      packed["w4row"], packed["b4"])

    # (num_tiles, tb) -> (Bp, 1) is a free metadata reshape; slice ragged tail back off.
    return out.reshape(Bp, 1)[:B]


def init_critic_q1_params(key, num_actions, num_inputs, hidden_size, init_w=0.003):
    """Logical params mirroring the PyTorch init ranges.
    Weights are stored as (in_features, out_features) — transpose of nn.Linear."""
    d_in = num_inputs + num_actions
    k = jax.random.split(key, 8)
    lim1 = 1.0 / jnp.sqrt(jnp.float32(d_in))
    lim2 = 1.0 / jnp.sqrt(jnp.float32(hidden_size))

    w1 = jax.random.uniform(k[0], (d_in, hidden_size), jnp.float32, -lim1, lim1)
    b1 = jax.random.uniform(k[1], (1, hidden_size), jnp.float32, -lim1, lim1)
    w2 = jax.random.uniform(k[2], (hidden_size, hidden_size), jnp.float32, -lim2, lim2)
    b2 = jax.random.uniform(k[3], (1, hidden_size), jnp.float32, -lim2, lim2)
    w3 = jax.random.uniform(k[4], (hidden_size, hidden_size), jnp.float32, -lim2, lim2)
    b3 = jax.random.uniform(k[5], (1, hidden_size), jnp.float32, -lim2, lim2)
    w4 = jax.random.uniform(k[6], (hidden_size, 1), jnp.float32, -init_w, init_w)
    b4 = jax.random.uniform(k[7], (1, 1), jnp.float32, -init_w, init_w)
    return (w1, b1, w2, b2, w3, b3, w4, b4)


def pack_params(params, num_inputs, dtype=jnp.bfloat16):
    """One-time repack for the kernel: split w1 into state/action halves, zero-pad
    the hidden dim to a multiple of 128 lanes, lay w4 out as a (1, Hp) row, and
    cast the MXU weights to `dtype` (bf16 by default, MXU-native on all gens;
    biases / output row / b4 stay f32 since the epilogue accumulates in f32)."""
    w1, b1, w2, b2, w3, b3, w4, b4 = params
    H = w1.shape[1]
    Hp = _round_up(H, _LANE)
    ph = Hp - H
    cast = lambda a: a.astype(dtype)
    return dict(
        w1s=cast(jnp.pad(w1[:num_inputs], ((0, 0), (0, ph)))),
        w1a=cast(jnp.pad(w1[num_inputs:], ((0, 0), (0, ph)))),
        b1=jnp.pad(b1, ((0, 0), (0, ph))).astype(jnp.float32),
        w2=cast(jnp.pad(w2, ((0, ph), (0, ph)))),
        b2=jnp.pad(b2, ((0, 0), (0, ph))).astype(jnp.float32),
        w3=cast(jnp.pad(w3, ((0, ph), (0, ph)))),
        b3=jnp.pad(b3, ((0, 0), (0, ph))).astype(jnp.float32),
        w4row=jnp.pad(w4.T, ((0, 0), (0, ph))).astype(jnp.float32),
        b4=b4.astype(jnp.float32),
    )


def _reference_forward(state, action, params, weight_dtype=jnp.float32):
    """Pure-JAX reference (eval-mode dropout == identity)."""
    w1, b1, w2, b2, w3, b3, w4, b4 = params
    wd = weight_dtype
    x = jnp.concatenate([state, action], axis=1).astype(jnp.float32)
    h = jnp.maximum(jnp.dot(x.astype(wd), w1.astype(wd),
                            preferred_element_type=jnp.float32) + b1, 0.0)
    h = jnp.maximum(jnp.dot(h.astype(wd), w2.astype(wd),
                            preferred_element_type=jnp.float32) + b2, 0.0)
    h = jnp.maximum(jnp.dot(h.astype(wd), w3.astype(wd),
                            preferred_element_type=jnp.float32) + b3, 0.0)
    return jnp.dot(h, w4, preferred_element_type=jnp.float32) + b4


if __name__ == "__main__":
    batch, num_inputs, num_actions, hidden = 8, 16, 16, 32

    key = jax.random.PRNGKey(0)
    k_s, k_a, k_p = jax.random.split(key, 3)
    state = jax.random.normal(k_s, (batch, num_inputs), jnp.float32)
    action = jax.random.normal(k_a, (batch, num_actions), jnp.float32)
    params = init_critic_q1_params(k_p, num_actions, num_inputs, hidden)

    # default path: bf16 MXU weights, f32 accumulation / epilogue
    packed_bf16 = pack_params(params, num_inputs)
    q = critic_q1_forward(state, action, packed_bf16)
    jax.block_until_ready(q)
    ref_bf16 = _reference_forward(state, action, params, weight_dtype=jnp.bfloat16)
    assert q.shape == (batch, 1)
    assert jnp.allclose(q, ref_bf16, atol=5e-3, rtol=5e-3)

    # full-f32 weight path, tight tolerance
    packed_f32 = pack_params(params, num_inputs, dtype=jnp.float32)
    q_f32 = critic_q1_forward(state, action, packed_f32)
    jax.block_until_ready(q_f32)
    ref_f32 = _reference_forward(state, action, params)
    assert jnp.allclose(q_f32, ref_f32, atol=1e-5, rtol=1e-5)

    # ragged batch + explicit small tile -> multi-step grid with lane-dense (1,tb)
    # output rows (exercises padding, pipelining, and the multi-tile out layout)
    b2n = 20
    state2 = jax.random.normal(jax.random.PRNGKey(1), (b2n, num_inputs), jnp.float32)
    action2 = jax.random.normal(jax.random.PRNGKey(2), (b2n, num_actions), jnp.float32)
    q2 = critic_q1_forward(state2, action2, packed_f32, block_b=8)
    jax.block_until_ready(q2)
    ref2 = _reference_forward(state2, action2, params)
    assert q2.shape == (b2n, 1)
    assert jnp.allclose(q2, ref2, atol=1e-5, rtol=1e-5)

    # same ragged multi-tile grid with the default bf16 weights
    q3 = critic_q1_forward(state2, action2, packed_bf16, block_b=8)
    jax.block_until_ready(q3)
    ref3 = _reference_forward(state2, action2, params, weight_dtype=jnp.bfloat16)
    assert jnp.allclose(q3, ref3, atol=5e-3, rtol=5e-3)

    print("KERNEL_OK")
</pallas_src>

<mosaic_0001>
module attributes {stable_mosaic.version = 11 : i64} {
  func.func @_critic_kernel(%arg0: i32, %arg1: memref<8x16xf32, #tpu.memory_space<vmem>>, %arg2: memref<8x16xf32, #tpu.memory_space<vmem>>, %arg3: memref<16x128xbf16, #tpu.memory_space<vmem>>, %arg4: memref<16x128xbf16, #tpu.memory_space<vmem>>, %arg5: memref<1x128xf32, #tpu.memory_space<vmem>>, %arg6: memref<128x128xbf16, #tpu.memory_space<vmem>>, %arg7: memref<1x128xf32, #tpu.memory_space<vmem>>, %arg8: memref<128x128xbf16, #tpu.memory_space<vmem>>, %arg9: memref<1x128xf32, #tpu.memory_space<vmem>>, %arg10: memref<1x128xf32, #tpu.memory_space<vmem>>, %arg11: memref<1x1xf32, #tpu.memory_space<vmem>>, %arg12: memref<1x8xf32, #tpu.memory_space<vmem>>) attributes {dimension_semantics = [#tpu.dimension_semantics<parallel>], iteration_bounds = array<i64: 1>, scalar_prefetch = 0 : i64, scratch_operands = 0 : i64, tpu.core_type = #tpu.core_type<tc>, window_params = [{transform_indices = @transform_0, window_bounds = array<i64: 8, 16>}, {transform_indices = @transform_1, window_bounds = array<i64: 8, 16>}, {pipeline_mode = #tpu.pipeline_mode<synchronous>, transform_indices = @transform_2, window_bounds = array<i64: 16, 128>}, {pipeline_mode = #tpu.pipeline_mode<synchronous>, transform_indices = @transform_3, window_bounds = array<i64: 16, 128>}, {pipeline_mode = #tpu.pipeline_mode<synchronous>, transform_indices = @transform_4, window_bounds = array<i64: 1, 128>}, {pipeline_mode = #tpu.pipeline_mode<synchronous>, transform_indices = @transform_5, window_bounds = array<i64: 128, 128>}, {pipeline_mode = #tpu.pipeline_mode<synchronous>, transform_indices = @transform_6, window_bounds = array<i64: 1, 128>}, {pipeline_mode = #tpu.pipeline_mode<synchronous>, transform_indices = @transform_7, window_bounds = array<i64: 128, 128>}, {pipeline_mode = #tpu.pipeline_mode<synchronous>, transform_indices = @transform_8, window_bounds = array<i64: 1, 128>}, {pipeline_mode = #tpu.pipeline_mode<synchronous>, transform_indices = @transform_9, window_bounds = array<i64: 1, 128>}, {pipeline_mode = #tpu.pipeline_mode<synchronous>, transform_indices = @transform_10, window_bounds = array<i64: 1, 1>}, {transform_indices = @transform_11, window_bounds = array<i64: 1, 8>}]} {
    %c0 = arith.constant 0 : index
    %c0_0 = arith.constant 0 : index
    %0 = vector.load %arg1[%c0, %c0_0] : memref<8x16xf32, #tpu.memory_space<vmem>>, vector<8x16xf32>
    %1 = arith.truncf %0 : vector<8x16xf32> to vector<8x16xbf16>
    %c0_1 = arith.constant 0 : index
    %c0_2 = arith.constant 0 : index
    %2 = vector.load %arg3[%c0_1, %c0_2] : memref<16x128xbf16, #tpu.memory_space<vmem>>, vector<16x128xbf16>
    %cst = arith.constant dense<0.000000e+00> : vector<8x128xf32>
    %3 = tpu.matmul %1, %2, %cst {dimension_numbers = #tpu.dot_dimension_numbers<[1], [0], [0], [1], [0, 0, 1, 1], [], []>} : vector<8x16xbf16>, vector<16x128xbf16>, vector<8x128xf32> -> vector<8x128xf32>
    %c0_3 = arith.constant 0 : index
    %c0_4 = arith.constant 0 : index
    %4 = vector.load %arg2[%c0_3, %c0_4] : memref<8x16xf32, #tpu.memory_space<vmem>>, vector<8x16xf32>
    %5 = arith.truncf %4 : vector<8x16xf32> to vector<8x16xbf16>
    %c0_5 = arith.constant 0 : index
    %c0_6 = arith.constant 0 : index
    %6 = vector.load %arg4[%c0_5, %c0_6] : memref<16x128xbf16, #tpu.memory_space<vmem>>, vector<16x128xbf16>
    %cst_7 = arith.constant dense<0.000000e+00> : vector<8x128xf32>
    %7 = tpu.matmul %5, %6, %cst_7 {dimension_numbers = #tpu.dot_dimension_numbers<[1], [0], [0], [1], [0, 0, 1, 1], [], []>} : vector<8x16xbf16>, vector<16x128xbf16>, vector<8x128xf32> -> vector<8x128xf32>
    %8 = arith.addf %3, %7 : vector<8x128xf32>
    %c0_8 = arith.constant 0 : index
    %c0_9 = arith.constant 0 : index
    %9 = vector.load %arg5[%c0_8, %c0_9] : memref<1x128xf32, #tpu.memory_space<vmem>>, vector<1x128xf32>
    %10 = vector.broadcast %9 : vector<1x128xf32> to vector<8x128xf32>
    %11 = arith.addf %8, %10 : vector<8x128xf32>
    %cst_10 = arith.constant 0.000000e+00 : f32
    %12 = vector.broadcast %cst_10 : f32 to vector<8x128xf32>
    %13 = arith.maximumf %11, %12 : vector<8x128xf32>
    %14 = arith.truncf %13 : vector<8x128xf32> to vector<8x128xbf16>
    %c0_11 = arith.constant 0 : index
    %c0_12 = arith.constant 0 : index
    %15 = vector.load %arg6[%c0_11, %c0_12] : memref<128x128xbf16, #tpu.memory_space<vmem>>, vector<128x128xbf16>
    %cst_13 = arith.constant dense<0.000000e+00> : vector<8x128xf32>
    %16 = tpu.matmul %14, %15, %cst_13 {dimension_numbers = #tpu.dot_dimension_numbers<[1], [0], [0], [1], [0, 0, 1, 1], [], []>} : vector<8x128xbf16>, vector<128x128xbf16>, vector<8x128xf32> -> vector<8x128xf32>
    %c0_14 = arith.constant 0 : index
    %c0_15 = arith.constant 0 : index
    %17 = vector.load %arg7[%c0_14, %c0_15] : memref<1x128xf32, #tpu.memory_space<vmem>>, vector<1x128xf32>
    %18 = vector.broadcast %17 : vector<1x128xf32> to vector<8x128xf32>
    %19 = arith.addf %16, %18 : vector<8x128xf32>
    %cst_16 = arith.constant 0.000000e+00 : f32
    %20 = vector.broadcast %cst_16 : f32 to vector<8x128xf32>
    %21 = arith.maximumf %19, %20 : vector<8x128xf32>
    %22 = arith.truncf %21 : vector<8x128xf32> to vector<8x128xbf16>
    %c0_17 = arith.constant 0 : index
    %c0_18 = arith.constant 0 : index
    %23 = vector.load %arg8[%c0_17, %c0_18] : memref<128x128xbf16, #tpu.memory_space<vmem>>, vector<128x128xbf16>
    %cst_19 = arith.constant dense<0.000000e+00> : vector<8x128xf32>
    %24 = tpu.matmul %22, %23, %cst_19 {dimension_numbers = #tpu.dot_dimension_numbers<[1], [0], [0], [1], [0, 0, 1, 1], [], []>} : vector<8x128xbf16>, vector<128x128xbf16>, vector<8x128xf32> -> vector<8x128xf32>
    %c0_20 = arith.constant 0 : index
    %c0_21 = arith.constant 0 : index
    %25 = vector.load %arg9[%c0_20, %c0_21] : memref<1x128xf32, #tpu.memory_space<vmem>>, vector<1x128xf32>
    %26 = vector.broadcast %25 : vector<1x128xf32> to vector<8x128xf32>
    %27 = arith.addf %24, %26 : vector<8x128xf32>
    %cst_22 = arith.constant 0.000000e+00 : f32
    %28 = vector.broadcast %cst_22 : f32 to vector<8x128xf32>
    %29 = arith.maximumf %27, %28 : vector<8x128xf32>
    %c0_23 = arith.constant 0 : index
    %c0_24 = arith.constant 0 : index
    %30 = vector.load %arg10[%c0_23, %c0_24] : memref<1x128xf32, #tpu.memory_space<vmem>>, vector<1x128xf32>
    %31 = vector.broadcast %30 : vector<1x128xf32> to vector<8x128xf32>
    %32 = arith.mulf %29, %31 : vector<8x128xf32>
    %cst_25 = arith.constant dense<0.000000e+00> : vector<8xf32>
    %33 = vector.multi_reduction <add>, %32, %cst_25 [1] : vector<8x128xf32> to vector<8xf32>
    %34 = vector.shape_cast %33 : vector<8xf32> to vector<8x1xf32>
    %35 = tpu.transpose %34, [1, 0] : vector<8x1xf32> -> vector<1x8xf32>
    %c0_26 = arith.constant 0 : index
    %c0_27 = arith.constant 0 : index
    %36 = vector.load %arg11[%c0_26, %c0_27] : memref<1x1xf32, #tpu.memory_space<vmem>>, vector<1x1xf32>
    %37 = vector.broadcast %36 : vector<1x1xf32> to vector<1x8xf32>
    %38 = arith.addf %35, %37 : vector<1x8xf32>
    %c0_28 = arith.constant 0 : index
    %c0_29 = arith.constant 0 : index
    %39 = vector.load %arg12[%c0_28, %c0_29] : memref<1x8xf32, #tpu.memory_space<vmem>>, vector<1x8xf32>
    tpu.vector_store %arg12[%c0_28, %c0_29], %38 {strides = array<i32>} : memref<1x8xf32, #tpu.memory_space<vmem>>, vector<1x8xf32>,
    return
  }
  func.func @transform_0(%arg0: i32) -> (i32, i32) {
    %c0_i32 = arith.constant 0 : i32
    %c0_i32_0 = arith.constant 0 : i32
    return %arg0, %c0_i32 : i32, i32
  }
  func.func @transform_1(%arg0: i32) -> (i32, i32) {
    %c0_i32 = arith.constant 0 : i32
    %c0_i32_0 = arith.constant 0 : i32
    return %arg0, %c0_i32 : i32, i32
  }
  func.func @transform_2(%arg0: i32) -> (i32, i32) {
    %c0_i32 = arith.constant 0 : i32
    %c0_i32_0 = arith.constant 0 : i32
    %c0_i32_1 = arith.constant 0 : i32
    return %c0_i32, %c0_i32_0 : i32, i32
  }
  func.func @transform_3(%arg0: i32) -> (i32, i32) {
    %c0_i32 = arith.constant 0 : i32
    %c0_i32_0 = arith.constant 0 : i32
    %c0_i32_1 = arith.constant 0 : i32
    return %c0_i32, %c0_i32_0 : i32, i32
  }
  func.func @transform_4(%arg0: i32) -> (i32, i32) {
    %c0_i32 = arith.constant 0 : i32
    %c0_i32_0 = arith.constant 0 : i32
    %c0_i32_1 = arith.constant 0 : i32
    return %c0_i32, %c0_i32_0 : i32, i32
  }
  func.func @transform_5(%arg0: i32) -> (i32, i32) {
    %c0_i32 = arith.constant 0 : i32
    %c0_i32_0 = arith.constant 0 : i32
    %c0_i32_1 = arith.constant 0 : i32
    return %c0_i32, %c0_i32_0 : i32, i32
  }
  func.func @transform_6(%arg0: i32) -> (i32, i32) {
    %c0_i32 = arith.constant 0 : i32
    %c0_i32_0 = arith.constant 0 : i32
    %c0_i32_1 = arith.constant 0 : i32
    return %c0_i32, %c0_i32_0 : i32, i32
  }
  func.func @transform_7(%arg0: i32) -> (i32, i32) {
    %c0_i32 = arith.constant 0 : i32
    %c0_i32_0 = arith.constant 0 : i32
    %c0_i32_1 = arith.constant 0 : i32
    return %c0_i32, %c0_i32_0 : i32, i32
  }
  func.func @transform_8(%arg0: i32) -> (i32, i32) {
    %c0_i32 = arith.constant 0 : i32
    %c0_i32_0 = arith.constant 0 : i32
    %c0_i32_1 = arith.constant 0 : i32
    return %c0_i32, %c0_i32_0 : i32, i32
  }
  func.func @transform_9(%arg0: i32) -> (i32, i32) {
    %c0_i32 = arith.constant 0 : i32
    %c0_i32_0 = arith.constant 0 : i32
    %c0_i32_1 = arith.constant 0 : i32
    return %c0_i32, %c0_i32_0 : i32, i32
  }
  func.func @transform_10(%arg0: i32) -> (i32, i32) {
    %c0_i32 = arith.constant 0 : i32
    %c0_i32_0 = arith.constant 0 : i32
    %c0_i32_1 = arith.constant 0 : i32
    return %c0_i32, %c0_i32_0 : i32, i32
  }
  func.func @transform_11(%arg0: i32) -> (i32, i32) {
    %c0_i32 = arith.constant 0 : i32
    %c0_i32_0 = arith.constant 0 : i32
    return %arg0, %c0_i32 : i32, i32
  }
}

</mosaic_0001>

<bundles_post_ra>
// kernel: critic_q1_forward.1
= control target key start
LH: loop header
LB: loop body
LE: loop exit
PB: predicated region body
PF: predicated region fallthrough
CT: control target
= control target key end

     0   :  { %s979_s0 = inlined_call_operand.hbm [shape: f32[8,16], index: 0, kind: input, shape index: {}]   ;;  %s980_s1 = inlined_call_operand.hbm [shape: f32[8,16], index: 1, kind: input, shape index: {}]   ;;  %s981_s2 = inlined_call_operand.vmem [shape: bf16[16,128], index: 2, kind: input, shape index: {}]   ;;  %s982_s3 = inlined_call_operand.vmem [shape: bf16[16,128], index: 3, kind: input, shape index: {}]   ;;  %s983_s4 = inlined_call_operand.vmem [shape: f32[1,128], index: 4, kind: input, shape index: {}]   ;;  %s984_s5 = inlined_call_operand.hbm [shape: bf16[128,128], index: 5, kind: input, shape index: {}]   ;;  %s985_s6 = inlined_call_operand.vmem [shape: f32[1,128], index: 6, kind: input, shape index: {}]   ;;  %s986_s7 = inlined_call_operand.hbm [shape: bf16[128,128], index: 7, kind: input, shape index: {}]   ;;  %s987_s8 = inlined_call_operand.hbm [shape: f32[1,128], index: 8, kind: input, shape index: {}]   ;;  %s988_s9 = inlined_call_operand.vmem [shape: f32[1,128], index: 9, kind: input, shape index: {}]   ;;  %s989_s10 = inlined_call_operand.<no memory space> [shape: f32[1,1], index: 10, kind: input, shape index: {}]   ;;  %s990_s11 = inlined_call_operand.hbm [shape: f32[1,8], index: 11, kind: output, shape index: {}]  }
   0x1   :  { %v16_v0 = vstv %s989_s10 }
   0x2   :  { %17 = vst [vmem:[#allocation2] sm:$0x1] %v16_v0 }
   0x3   :  { %18 = vsyncpa [#allocation4], 0 }
   0x4   :  { %19 = vsyncpa [#allocation7], 0 }
   0x5   :  { %20 = vsyncpa [#allocation10], 0 }
   0x6   :  { %21 = vsyncpa [#allocation5], 0  ;;  %s786_s19 = smov [#allocation6]   ;;  %s646_s23 = scalar_lea.hbm %s980_s1, 128 }
   0x7   :  { %s38_s20 = sshll.u32 %s786_s19, 4  ;;  %p647_p0 = scmp.ne.s32.totalorder %s980_s1, %s646_s23  ;;  %s39_s20 = int_to_ptr.vmem [resolvable:$true] %s38_s20 }
   0x8   :  { %p650_p1 = scmp.lt.u32.totalorder %s646_s23, %s980_s1 }
   0xa   :  { %p652_p2 = pnand %p650_p1, %p647_p0 }
   0xc   :  { %655 = shalt.err (!%p652_p2)
}
   0xd   :  { %s656_s10 = scalar_lea.vmem %s39_s20, 128  ;;  %p661_p4 = scmp.lt.s32.totalorder %s39_s20, %s39_s20 }
   0xe   :  { %p657_p3 = scmp.ne.s32.totalorder %s39_s20, %s656_s10  ;;  %p662_p5 = scmp.lt.s32.totalorder %s656_s10, %s656_s10 }
  0x10   :  { %p663_p6 = por %p662_p5, %p661_p4 }
  0x12   :  { %p664_p7 = pnand %p663_p6, %p657_p3 }
  0x14   :  { %667 = shalt.err (!%p664_p7)
}
  0x15   :  { %41 = dma.hbm_to_vmem [thread:$0]  %s980_s1, 128, %s39_s20, [#allocation7]  }
  0x16   :  { %s787_s30 = smov [#allocation9]   ;;  %s788_s13 = smov [#allocation3]  }
  0x17   :  { %s67_s12 = sshll.u32 %s787_s30, 4  ;;  %s28_s14 = sshll.u32 %s788_s13, 4  ;;  %s68_s12 = int_to_ptr.vmem [resolvable:$true] %s67_s12  ;;  %s29_s14 = int_to_ptr.vmem [resolvable:$true] %s28_s14 }
  0x18   :  { %s668_s17 = scalar_lea.hbm %s986_s7, 1024 }
  0x19   :  { %p669_p8 = scmp.ne.s32.totalorder %s986_s7, %s668_s17  ;;  %p672_p9 = scmp.lt.u32.totalorder %s668_s17, %s986_s7 }
  0x1b   :  { %p674_p10 = pnand %p672_p9, %p669_p8 }
  0x1d   :  { %677 = shalt.err (!%p674_p10)
}
  0x1e   :  { %s678_s1 = scalar_lea.vmem %s68_s12, 1024  ;;  %p683_p12 = scmp.lt.s32.totalorder %s68_s12, %s68_s12 }
  0x1f   :  { %p679_p11 = scmp.ne.s32.totalorder %s68_s12, %s678_s1  ;;  %p684_p13 = scmp.lt.s32.totalorder %s678_s1, %s678_s1 }
  0x21   :  { %p685_p0 = por %p684_p13, %p683_p12 }
  0x23   :  { %p686_p1 = pnand %p685_p0, %p679_p11 }
  0x25   :  { %689 = shalt.err (!%p686_p1)
}
  0x26   :  { %s789_s20 = smov 64   ;;  %s790_s23 = smov 4  }
  0x27   :  { %73 = dma.hbm_to_vmem [thread:$0]  %s986_s7, 1024, %s68_s12, [#allocation10], %s789_s20, %s789_s20, %s790_s23  }
  0x28   :  { %s690_s10 = scalar_lea.hbm %s979_s0, 128 }
  0x29   :  { %p691_p2 = scmp.ne.s32.totalorder %s979_s0, %s690_s10  ;;  %p694_p3 = scmp.lt.u32.totalorder %s690_s10, %s979_s0 }
  0x2b   :  { %p696_p4 = pnand %p694_p3, %p691_p2 }
  0x2d   :  { %699 = shalt.err (!%p696_p4)
}
  0x2e   :  { %s700_s15 = scalar_lea.vmem %s29_s14, 128  ;;  %p705_p6 = scmp.lt.s32.totalorder %s29_s14, %s29_s14 }
  0x2f   :  { %p701_p5 = scmp.ne.s32.totalorder %s29_s14, %s700_s15  ;;  %p706_p7 = scmp.lt.s32.totalorder %s700_s15, %s700_s15 }
  0x31   :  { %p707_p8 = por %p706_p7, %p705_p6 }
  0x33   :  { %p708_p9 = pnand %p707_p8, %p701_p5 }
  0x35   :  { %711 = shalt.err (!%p708_p9)
}
  0x36   :  { %31 = dma.hbm_to_vmem [thread:$0]  %s979_s0, 128, %s29_s14, [#allocation4]  }
  0x37   :  { %s791_s16 = smov [#allocation8]   ;;  %s792_s18 = smov [#allocation11]  }
  0x38   :  { %s53_s17 = sshll.u32 %s791_s16, 4  ;;  %s80_s19 = sshll.u32 %s792_s18, 4  ;;  %s54_s17 = int_to_ptr.vmem [resolvable:$true] %s53_s17  ;;  %s81_s19 = int_to_ptr.vmem [resolvable:$true] %s80_s19 }
  0x39   :  { %s712_s1 = scalar_lea.hbm %s984_s5, 1024 }
  0x3a   :  { %p713_p10 = scmp.ne.s32.totalorder %s984_s5, %s712_s1  ;;  %p716_p11 = scmp.lt.u32.totalorder %s712_s1, %s984_s5 }
  0x3c   :  { %p718_p12 = pnand %p716_p11, %p713_p10 }
  0x3e   :  { %721 = shalt.err (!%p718_p12)
}
  0x3f   :  { %s722_s0 = scalar_lea.vmem %s54_s17, 1024  ;;  %p727_p0 = scmp.lt.s32.totalorder %s54_s17, %s54_s17 }
  0x40   :  { %p723_p13 = scmp.ne.s32.totalorder %s54_s17, %s722_s0  ;;  %p728_p1 = scmp.lt.s32.totalorder %s722_s0, %s722_s0 }
  0x42   :  { %p729_p2 = por %p728_p1, %p727_p0 }
  0x44   :  { %p730_p3 = pnand %p729_p2, %p723_p13 }
  0x46   :  { %733 = shalt.err (!%p730_p3)
}
  0x47   :  { %59 = dma.hbm_to_vmem [thread:$0]  %s984_s5, 1024, %s54_s17, [#allocation7], %s789_s20, %s789_s20, %s790_s23  }
  0x48   :  { %s734_s30 = scalar_lea.hbm %s987_s8, 16 }
  0x49   :  { %p735_p4 = scmp.ne.s32.totalorder %s987_s8, %s734_s30  ;;  %p738_p5 = scmp.lt.u32.totalorder %s734_s30, %s987_s8 }
  0x4b   :  { %p740_p6 = pnand %p738_p5, %p735_p4 }
  0x4d   :  { %743 = shalt.err (!%p740_p6)
}
  0x4e   :  { %s744_s16 = scalar_lea.vmem %s81_s19, 16  ;;  %s748_s18 = scalar_lea.vmem %s81_s19, 32 }
  0x4f   :  { %p745_p7 = scmp.ne.s32.totalorder %s81_s19, %s744_s16  ;;  %p749_p8 = scmp.lt.s32.totalorder %s81_s19, %s81_s19 }
  0x50   :  { %p750_p9 = scmp.lt.s32.totalorder %s748_s18, %s744_s16 }
  0x52   :  { %p751_p10 = por %p750_p9, %p749_p8 }
  0x54   :  { %p752_p11 = pnand %p751_p10, %p745_p7 }
  0x56   :  { %755 = shalt.err (!%p752_p11)
}
  0x57   :  { %83 = dma.hbm_to_vmem [thread:$0]  %s987_s8, 16, %s81_s19, [#allocation10]  }
  0x58   :  { %778 = dma.done.wait [#allocation4], 128  }
  0x59   :  { %779 = vsyncadd [#allocation4], 4294967168 }
  0x5a   :  { %780 = dma.done.wait [#allocation7], 1152  }
  0x5b   :  { %781 = vsyncadd [#allocation7], 4294966144 }
  0x5c   :  { %782 = dma.done.wait [#allocation10], 1040  }
  0x5d   :  { %783 = vsyncadd [#allocation10], 4294966256  ;;  %v793_v1 = vmov 0.0   ;;  %vm794_vm0 = vmmov 0   ;;  %v628_v2 = vld [vmem:[%s982_s3] sm:$0xff]   ;;  %v108_v4 = vld [vmem:[#allocation6] sm:$0xff]  ;;  %v494_v57 = vlaneseq }
  0x5e   :  { %564 = vmatprep.subr.bf16.mxu0 %v793_v1  ;;  %570 = vmatprep.subr.bf16.mxu1 %v793_v1  ;;  %v629_v3 = vld [vmem:[%s981_s2] sm:$0xff]   ;;  %vm118_vm1 = vcmask 130048   ;;  %v109_v6 = vpack.c.bf16 %v108_v4, %v108_v4  ;;  %v630_v8 = vld [vmem:[#allocation8] sm:$0xff]   ;;  %v633_v11 = vld [vmem:[#allocation8 + $0x18] sm:$0xff]   ;;  %v795_v45 = vmov 0   ;;  %vm499_vm2 = vcmask 57344  }
  0x5f   :  { %566 = vmatprep.mubr.msk.bf16.mxu0 %vm794_vm0, %v793_v1  ;;  %572 = vmatprep.mubr.msk.bf16.mxu1 %vm794_vm0, %v793_v1  ;;  %v104_v5 = vld [vmem:[#allocation3] sm:$0xff]  ;;  %v631_v9 = vld [vmem:[#allocation8 + $0x8] sm:$0xff]   ;;  %v634_v12 = vld [vmem:[#allocation8 + $0x20] sm:$0xff]   ;;  %v495_v58 = vshrl.u32 %v494_v57, 7 }
  0x60   :  { %565 = vmatpush3.bf16.msra.mxu0 %v628_v2  ;;  %571 = vmatpush3.bf16.msra.mxu1 %v629_v3  ;;  %v105_v7 = vpack.c.bf16 %v104_v5, %v104_v5  ;;  %v632_v10 = vld [vmem:[#allocation8 + $0x10] sm:$0xff]   ;;  %v635_v13 = vld [vmem:[#allocation8 + $0x28] sm:$0xff]   ;;  %v637_v15 = vld [vmem:[#allocation8 + $0x38] sm:$0xff]  }
  0x61   :  { %576 = vmatprep.subr.bf16.mxu0 %v793_v1  ;;  %596 = vmatprep.subr.bf16.mxu1 %v793_v1  ;;  %v636_v14 = vld [vmem:[#allocation8 + $0x30] sm:$0xff]   ;;  %v638_v16 = vld [vmem:[#allocation9] sm:$0xff]   ;;  %v639_v17 = vld [vmem:[#allocation9 + $0x8] sm:$0xff]   ;;  %v496_v59 = vsub.s32 0, %v495_v58 }
  0x62   :  { %v640_v18 = vld [vmem:[#allocation9 + $0x10] sm:$0xff]   ;;  %v641_v19 = vld [vmem:[#allocation9 + $0x18] sm:$0xff]   ;;  %v642_v20 = vld [vmem:[#allocation9 + $0x20] sm:$0xff]   ;;  %627 = vset.pattern.permute.xlu0 %v795_v45 }
  0x63   :  { %567 = vmatmul.mubr.msk.bf16.vlgmr.msra.gmra.mrb[0].mxu0 %vm118_vm1, %v109_v6  ;;  %573 = vmatmul.mubr.msk.bf16.vlgmr.msra.gmra.mrb[0].mxu1 %vm118_vm1, %v105_v7  ;;  %v643_v21 = vld [vmem:[#allocation9 + $0x28] sm:$0xff]   ;;  %v644_v35 = vld [vmem:[#allocation9 + $0x30] sm:$0xff]   ;;  %v645_v36 = vld [vmem:[#allocation9 + $0x38] sm:$0xff]  }
  0x64   :  { %577 = vmatpush3.bf16.msra.mxu0 %v630_v8  ;;  %592 = vmatprep.mubr.msk.bf16.mxu0 %vm794_vm0, %v793_v1  ;;  %v522_v24 = vld [vmem:[%s983_s4] ss:$0 sm:$0xff]  ;;  %v532_v46 = vld [vmem:[#allocation11] ss:$0 sm:$0xff] }
  0x65   :  { %578 = vmatprep.subr.bf16.mxu0 %v793_v1  ;;  %612 = vmatprep.mubr.msk.bf16.mxu1 %vm794_vm0, %v793_v1  ;;  %v523_v37 = vld [vmem:[%s985_s6] ss:$0 sm:$0xff]  ;;  %s796_s6 = smov [#allocation12]  }
  0x66   :  { %597 = vmatpush3.bf16.msra.mxu1 %v638_v16  ;;  %v541_v51 = vld [vmem:[%s988_s9] ss:$0 sm:$0xff]  ;;  %s507_s24 = sshll.u32 %s796_s6, 4  ;;  %s508_s24 = int_to_ptr.vmem [resolvable:$true] %s507_s24 }
  0x67   :  { %598 = vmatprep.subr.bf16.mxu1 %v793_v1  ;;  %v488_v55 = vld [vmem:[#allocation2] sm:$0x1]  ;;  %s756_s9 = scalar_lea.vmem %s508_s24, 16  ;;  %s760_s25 = scalar_lea.vmem %s508_s24, 32 }
  0x68   :  { %579 = vmatpush3.bf16.msra.mxu0 %v631_v9  ;;  %p757_p12 = scmp.ne.s32.totalorder %s508_s24, %s756_s9  ;;  %p761_p13 = scmp.lt.s32.totalorder %s508_s24, %s508_s24 }
  0x69   :  { %580 = vmatprep.subr.bf16.mxu0 %v793_v1  ;;  %p762_p0 = scmp.lt.s32.totalorder %s760_s25, %s756_s9 }
  0x6a   :  { %599 = vmatpush3.bf16.msra.mxu1 %v639_v17 }
  0x6b   :  { %600 = vmatprep.subr.bf16.mxu1 %v793_v1  ;;  %p763_p1 = por %p762_p0, %p761_p13 }
  0x6c   :  { %581 = vmatpush3.bf16.msra.mxu0 %v632_v10 }
  0x6d   :  { %582 = vmatprep.subr.bf16.mxu0 %v793_v1  ;;  %p764_p2 = pnand %p763_p1, %p757_p12 }
  0x6e   :  { %601 = vmatpush3.bf16.msra.mxu1 %v640_v18 }
  0x6f   :  { %602 = vmatprep.subr.bf16.mxu1 %v793_v1 }
  0x70   :  { %583 = vmatpush3.bf16.msra.mxu0 %v633_v11 }
  0x71   :  { %584 = vmatprep.subr.bf16.mxu0 %v793_v1 }
  0x72   :  { %603 = vmatpush3.bf16.msra.mxu1 %v641_v19 }
  0x73   :  { %604 = vmatprep.subr.bf16.mxu1 %v793_v1 }
  0x74   :  { %585 = vmatpush3.bf16.msra.mxu0 %v634_v12 }
  0x75   :  { %586 = vmatprep.subr.bf16.mxu0 %v793_v1 }
  0x76   :  { %605 = vmatpush3.bf16.msra.mxu1 %v642_v20 }
  0x77   :  { %606 = vmatprep.subr.bf16.mxu1 %v793_v1 }
  0x78   :  { %587 = vmatpush3.bf16.msra.mxu0 %v635_v13 }
  0x79   :  { %588 = vmatprep.subr.bf16.mxu0 %v793_v1 }
  0x7a   :  { %607 = vmatpush3.bf16.msra.mxu1 %v643_v21 }
  0x7b   :  { %608 = vmatprep.subr.bf16.mxu1 %v793_v1 }
  0x7c   :  { %589 = vmatpush3.bf16.msra.mxu0 %v636_v14 }
  0x7d   :  { %590 = vmatprep.subr.bf16.mxu0 %v793_v1 }
  0x7e   :  { %609 = vmatpush3.bf16.msra.mxu1 %v644_v35 }
  0x7f   :  { %610 = vmatprep.subr.bf16.mxu1 %v793_v1 }
  0x80   :  { %591 = vmatpush3.bf16.msra.mxu0 %v637_v15 }
  0x82   :  { %611 = vmatpush3.bf16.msra.mxu1 %v645_v36 }
 0x136   :  { %v156_v22 = vpop.f32.mrb[0].mxu0  ;;  %v205_v23 = vpop.f32.mrb[0].mxu1 }
 0x137   :  { %v568_v25 = vpop.f32.mrb[1].mxu0  ;;  %v206_v26 = vadd.f32 %v205_v23, %v156_v22  ;;  %v574_v27 = vpop.f32.mrb[1].mxu1 }
 0x138   :  { %v159_v28 = vpop.f32.mrb[2].mxu0  ;;  %v208_v29 = vpop.f32.mrb[2].mxu1 }
 0x139   :  { %v569_v30 = vpop.f32.mrb[3].mxu0  ;;  %v218_v31 = vadd.f32 %v522_v24, %v206_v26  ;;  %v575_v32 = vpop.f32.mrb[3].mxu1 }
 0x13b   :  { %v219_v33 = vmax.f32 %v218_v31, 0.0 }
 0x13d   :  { %v220_v34 = vpack.c.bf16 %v219_v33, %v219_v33 }
 0x13f   :  { %593 = vmatmul.mubr.bf16.vlgmr.msra.gmra.mrb[4].mxu0 %v220_v34 }
 0x212   :  { %v326_v38 = vpop.f32.mrb[4].mxu0 }
 0x213   :  { %v327_v39 = vadd.f32 %v523_v37, %v326_v38  ;;  %v594_v40 = vpop.f32.mrb[5].mxu0 }
 0x214   :  { %v329_v41 = vpop.f32.mrb[6].mxu0 }
 0x215   :  { %v332_v42 = vmax.f32 %v327_v39, 0.0  ;;  %v595_v43 = vpop.f32.mrb[7].mxu0 }
 0x217   :  { %v333_v44 = vpack.c.bf16 %v332_v42, %v332_v42 }
 0x219   :  { %613 = vmatmul.mubr.bf16.vlgmr.msra.gmra.mrb[4].mxu1 %v333_v44 }
 0x2ec   :  { %v439_v47 = vpop.f32.mrb[4].mxu1 }
 0x2ed   :  { %v440_v48 = vadd.f32 %v532_v46, %v439_v47  ;;  %v614_v49 = vpop.f32.mrb[5].mxu1 }
 0x2ee   :  { %v442_v50 = vpop.f32.mrb[6].mxu1 }
 0x2ef   :  { %v445_v52 = vmax.f32 %v440_v48, 0.0  ;;  %v615_v53 = vpop.f32.mrb[7].mxu1 }
 0x2f1   :  { %v453_v54 = vmul.f32 %v541_v51, %v445_v52 }
 0x2f3   :  { %454 = vadd.xlane.f32.xlu0 %v453_v54 }
 0x309   :  { %491 = vperm.xlu0 %627, %v488_v55  }
 0x380   :  { %v455_v56 = vpop.xlane.xlu0 %454 }
 0x381   :  { %456 = vxpose.xlu1.b32.start.end [1/1] (short) (narrow) %v455_v56, 8 }
 0x388   :  { %v492_v60 = vpop.permute.xlu0 %491 }
 0x389   :  { %v497_v61 = vrot.slane %v492_v60, %v496_v59 }
 0x401   :  { %v472_v62 = vpop.trf.xlu1 }
 0x402   :  { %v498_v63 = vadd.f32 %v497_v61, %v472_v62 }
 0x404   :  { %500 = vst.msk [vmem:[#allocation12] sm:$0x1] %vm499_vm2, %v498_v63 }
 0x405   :  { %767 = shalt.err (!%p764_p2)
}
 0x406   :  { %s768_s0 = scalar_lea.hbm %s990_s11, 16 }
 0x407   :  { %p769_p3 = scmp.ne.s32.totalorder %s990_s11, %s768_s0  ;;  %p772_p4 = scmp.lt.u32.totalorder %s768_s0, %s990_s11 }
 0x409   :  { %p774_p5 = pnand %p772_p4, %p769_p3 }
 0x40b   :  { %777 = shalt.err (!%p774_p5)
}
 0x40c   :  { %510 = dma.vmem_to_hbm [thread:$0]  %s508_s24, 16, %s990_s11, [#allocation5]  }
 0x40d   :  { %784 = dma.done.wait [#allocation5], 16  }
 0x40e   :  { %785 = vsyncadd [#allocation5], 4294967280 }
 0x40f   :  { %514 = vsyncpa [#allocation4], 1 }
 0x410   :  { %515 = vsyncpa [#allocation7], 1 }
 0x411   :  { %516 = vsyncpa [#allocation10], 1 }
 0x412   :  { %517 = vsyncpa [#allocation5], 1 }

</bundles_post_ra>
